<compile_context>
chip_gen: v7x
topology: tpu7x:2x2x1
jax: 0.10.0
libtpu: 0.0.40
codegen_flags: <defaults>
</compile_context>

<pallas_src>
import itertools

import numpy as np

import jax
import jax.numpy as jnp
from jax.experimental import pallas as pl
from jax.experimental.pallas import tpu as pltpu


def _anchor_kernel(shift_ref, const_ref, out_ref):
    """out[loc, 4a+f] = mask_x[f]*sx[loc] + mask_y[f]*sy[loc] + cell[a,f].

    shift_ref : (T, 2)    int32; column 0 = shift_x, column 1 = shift_y.
    const_ref : (3, K*4)  int32; rows [mask_x, mask_y, cell] with
                mask_x[4a+0]=1, mask_y[4a+1]=1, cell[4a+2]=w_a, cell[4a+3]=h_a.
    out_ref   : (T, K*4)  int32; locations on sublanes, anchor fields on lanes
                (exactly the PyTorch (HW*K, 4) row-major order).

    Single full-block store; no iota / div / mod / select.
    """
    sx = shift_ref[:, 0:1]        # (T, 1)
    sy = shift_ref[:, 1:2]        # (T, 1)
    mask_x = const_ref[0:1, :]    # (1, K*4)
    mask_y = const_ref[1:2, :]    # (1, K*4)
    cell = const_ref[2:3, :]      # (1, K*4)
    out_ref[...] = sx * mask_x + sy * mask_y + cell


class AnchorGeneratorPallas:
    # Outputs at or below this size go through plain XLA (launch cost dominates).
    _SMALL_BYTES = 256 * 1024
    # Sublane-tile cap: 4096 * 60 * 4 B ~= 1 MiB per output block.
    _TILE_CAP = 4096

    def __init__(self, widths=(30, 90, 150, 210, 300), heights=(20, 40, 60)):
        self.widths = tuple(widths)
        self.heights = tuple(heights)
        combos = list(itertools.product(self.widths, self.heights))  # (K, 2) (w, h)
        self.cell_anchors = jnp.asarray(combos, dtype=jnp.int32)
        self._K = len(combos)
        K4 = 4 * self._K
        # Per-output-lane constants: rows [mask_x, mask_y, cell].
        col = np.zeros((3, K4), dtype=np.int32)
        col[0, 0::4] = 1
        col[1, 1::4] = 1
        col[2, 2::4] = [w for (w, _h) in combos]
        col[2, 3::4] = [h for (_w, h) in combos]
        self._col_consts = jnp.asarray(col)  # (3, K*4)

    # ---------------------------------------------------------------- tiling
    @classmethod
    def _tiling(cls, hw):
        """Return (tile, n_tiles, hw_padded) with tile % 8 == 0."""
        if hw >= 256:
            # >= 2 tiles so a "parallel" grid axis can be split across the two
            # TensorCores on v7x; on v5e/v6e the extra step is ~0.35 us noise.
            n_tiles = max(2, -(-hw // cls._TILE_CAP))
        else:
            n_tiles = 1
        tile = -(-hw // n_tiles)
        tile = -(-tile // 8) * 8          # round up to a multiple of 8 sublanes
        return tile, n_tiles, tile * n_tiles

    # ------------------------------------------------------------ small path
    def _jax_path(self, grid_h, grid_w, stride_h, stride_w):
        xs = jnp.arange(grid_w, dtype=jnp.int32) * stride_w
        ys = jnp.arange(grid_h, dtype=jnp.int32) * stride_h
        sy, sx = jnp.meshgrid(ys, xs, indexing="ij")
        shifts = jnp.stack([sx.reshape(-1), sy.reshape(-1)], axis=1)   # (HW, 2)
        hw = grid_h * grid_w
        K = self._K
        shifts_b = jnp.broadcast_to(shifts[:, None, :], (hw, K, 2))
        cells_b = jnp.broadcast_to(self.cell_anchors[None], (hw, K, 2))
        return jnp.concatenate([shifts_b, cells_b], axis=2).reshape(1, hw * K, 4)

    # ----------------------------------------------------------------- call
    def __call__(self, image, feature_map, use_pallas=None):
        assert image.shape[0] == 1 and feature_map.shape[0] == 1, \
            "AnchorGenerator requires batch size of 1"
        img_h, img_w = image.shape[-2:]
        grid_h, grid_w = feature_map.shape[-2:]
        stride_h = img_h // grid_h
        stride_w = img_w // grid_w

        K = self._K
        K4 = 4 * K
        HW = grid_h * grid_w

        if use_pallas is None:
            use_pallas = (K4 * HW * 4) > self._SMALL_BYTES
        if not use_pallas:
            return self._jax_path(grid_h, grid_w, stride_h, stride_w)

        # Host-side glue (shape-dependent only): per-location shifts, locations
        # on the sublane axis so they broadcast across the K*4 lane axis.
        xs = jnp.tile(jnp.arange(grid_w, dtype=jnp.int32) * stride_w, grid_h)
        ys = jnp.repeat(jnp.arange(grid_h, dtype=jnp.int32) * stride_h, grid_w)
        shift_rows = jnp.stack([xs, ys], axis=1)                       # (HW, 2)

        T, n_tiles, HW_pad = self._tiling(HW)
        if HW_pad != HW:
            shift_rows = jnp.pad(shift_rows, ((0, HW_pad - HW), (0, 0)))

        out = pl.pallas_call(
            _anchor_kernel,
            out_shape=jax.ShapeDtypeStruct((HW_pad, K4), jnp.int32),
            grid=(n_tiles,),
            in_specs=[
                pl.BlockSpec((T, 2), lambda i: (i, 0)),     # per-location shifts
                pl.BlockSpec((3, K4), lambda i: (0, 0)),    # tiny constants (fetched once)
            ],
            out_specs=pl.BlockSpec((T, K4), lambda i: (i, 0)),
            compiler_params=pltpu.CompilerParams(
                dimension_semantics=("parallel",)),
        )(shift_rows, self._col_consts)                      # (HW_pad, K*4)

        # Drop padded rows, then a pure metadata reshape to (1, HW*K, 4):
        # out[loc, 4a+f] -> anchors[0, loc*K + a, f]  (no transpose needed).
        return out[:HW].reshape(1, HW * K, 4)


def _reference(image, feature_map, widths, heights):
    """Pure-JAX reference mirroring the PyTorch code (for verification)."""
    img_h, img_w = image.shape[-2:]
    grid_h, grid_w = feature_map.shape[-2:]
    stride_h, stride_w = img_h // grid_h, img_w // grid_w
    cells = jnp.asarray(list(itertools.product(widths, heights)), dtype=jnp.int32)
    shifts_x = jnp.arange(grid_w, dtype=jnp.int32) * stride_w
    shifts_y = jnp.arange(grid_h, dtype=jnp.int32) * stride_h
    sy, sx = jnp.meshgrid(shifts_y, shifts_x, indexing="ij")
    shifts = jnp.stack([sx.reshape(-1), sy.reshape(-1)], axis=1)[:, None, :]
    shifts = jnp.broadcast_to(shifts, (grid_h * grid_w, cells.shape[0], 2))
    cells_b = jnp.broadcast_to(cells[None], (grid_h * grid_w, cells.shape[0], 2))
    return jnp.concatenate([shifts, cells_b], axis=2).reshape(1, -1, 4)


if __name__ == "__main__":
    key = jax.random.PRNGKey(0)
    k1, k2, k3, k4, k5, k6 = jax.random.split(key, 6)
    gen = AnchorGeneratorPallas()

    # Case 1: tiny 16x16 grid (output ~60 KiB) -> auto-dispatch to pure JAX.
    img1 = jax.random.normal(k1, (1, 3, 64, 64), dtype=jnp.float32)
    fm1 = jax.random.normal(k2, (1, 8, 16, 16), dtype=jnp.float32)
    a1 = jax.block_until_ready(gen(img1, fm1))
    r1 = _reference(img1, fm1, gen.widths, gen.heights)
    assert a1.shape == (1, 16 * 16 * 15, 4), a1.shape
    assert bool(jnp.all(a1 == r1)), "mismatch vs reference (16x16, jax path)"

    # Case 1b: same tiny grid forced through the Pallas kernel (2 tiles, T=128).
    a1p = jax.block_until_ready(gen(img1, fm1, use_pallas=True))
    assert bool(jnp.all(a1p == r1)), "mismatch vs reference (16x16, pallas path)"

    # Case 2: 64x64 grid (HW=4096) -> Pallas path, 2 sublane tiles, no padding.
    img2 = jax.random.normal(k3, (1, 3, 256, 256), dtype=jnp.float32)
    fm2 = jax.random.normal(k4, (1, 8, 64, 64), dtype=jnp.float32)
    a2 = jax.block_until_ready(gen(img2, fm2))
    r2 = _reference(img2, fm2, gen.widths, gen.heights)
    assert a2.shape == (1, 64 * 64 * 15, 4), a2.shape
    assert bool(jnp.all(a2 == r2)), "mismatch vs reference (64x64)"

    # Case 3: 50x50 grid (HW=2500, not a multiple of 8) -> padded Pallas path.
    img3 = jax.random.normal(k5, (1, 3, 200, 200), dtype=jnp.float32)
    fm3 = jax.random.normal(k6, (1, 8, 50, 50), dtype=jnp.float32)
    a3 = jax.block_until_ready(gen(img3, fm3))
    r3 = _reference(img3, fm3, gen.widths, gen.heights)
    assert a3.shape == (1, 50 * 50 * 15, 4), a3.shape
    assert bool(jnp.all(a3 == r3)), "mismatch vs reference (50x50, padded)"

    print("KERNEL_OK")
</pallas_src>

<mosaic_0001>
module attributes {stable_mosaic.version = 11 : i64} {
  func.func @_anchor_kernel(%arg0: i32, %arg1: memref<128x2xi32, #tpu.memory_space<vmem>>, %arg2: memref<3x60xi32, #tpu.memory_space<vmem>>, %arg3: memref<128x60xi32, #tpu.memory_space<vmem>>) attributes {dimension_semantics = [#tpu.dimension_semantics<parallel>], iteration_bounds = array<i64: 2>, scalar_prefetch = 0 : i64, scratch_operands = 0 : i64, tpu.core_type = #tpu.core_type<tc>, window_params = [{transform_indices = @transform_0, window_bounds = array<i64: 128, 2>}, {pipeline_mode = #tpu.pipeline_mode<synchronous>, transform_indices = @transform_1, window_bounds = array<i64: 3, 60>}, {transform_indices = @transform_2, window_bounds = array<i64: 128, 60>}]} {
    %c0 = arith.constant 0 : index
    %c0_0 = arith.constant 0 : index
    %0 = vector.load %arg1[%c0, %c0_0] : memref<128x2xi32, #tpu.memory_space<vmem>>, vector<128x1xi32>
    %c0_1 = arith.constant 0 : index
    %c1 = arith.constant 1 : index
    %1 = vector.load %arg1[%c0_1, %c1] : memref<128x2xi32, #tpu.memory_space<vmem>>, vector<128x1xi32>
    %c0_2 = arith.constant 0 : index
    %c0_3 = arith.constant 0 : index
    %2 = vector.load %arg2[%c0_2, %c0_3] : memref<3x60xi32, #tpu.memory_space<vmem>>, vector<1x60xi32>
    %c1_4 = arith.constant 1 : index
    %c0_5 = arith.constant 0 : index
    %3 = vector.load %arg2[%c1_4, %c0_5] : memref<3x60xi32, #tpu.memory_space<vmem>>, vector<1x60xi32>
    %c2 = arith.constant 2 : index
    %c0_6 = arith.constant 0 : index
    %4 = vector.load %arg2[%c2, %c0_6] : memref<3x60xi32, #tpu.memory_space<vmem>>, vector<1x60xi32>
    %5 = vector.broadcast %0 : vector<128x1xi32> to vector<128x60xi32>
    %6 = vector.broadcast %2 : vector<1x60xi32> to vector<128x60xi32>
    %7 = arith.muli %5, %6 : vector<128x60xi32>
    %8 = vector.broadcast %1 : vector<128x1xi32> to vector<128x60xi32>
    %9 = vector.broadcast %3 : vector<1x60xi32> to vector<128x60xi32>
    %10 = arith.muli %8, %9 : vector<128x60xi32>
    %11 = arith.addi %7, %10 : vector<128x60xi32>
    %12 = vector.broadcast %4 : vector<1x60xi32> to vector<128x60xi32>
    %13 = arith.addi %11, %12 : vector<128x60xi32>
    %c0_7 = arith.constant 0 : index
    %c0_8 = arith.constant 0 : index
    %14 = vector.load %arg3[%c0_7, %c0_8] : memref<128x60xi32, #tpu.memory_space<vmem>>, vector<128x60xi32>
    tpu.vector_store %arg3[%c0_7, %c0_8], %13 {strides = array<i32>} : memref<128x60xi32, #tpu.memory_space<vmem>>, vector<128x60xi32>,
    return
  }
  func.func @transform_0(%arg0: i32) -> (i32, i32) {
    %c0_i32 = arith.constant 0 : i32
    %c0_i32_0 = arith.constant 0 : i32
    return %arg0, %c0_i32 : i32, i32
  }
  func.func @transform_1(%arg0: i32) -> (i32, i32) {
    %c0_i32 = arith.constant 0 : i32
    %c0_i32_0 = arith.constant 0 : i32
    %c0_i32_1 = arith.constant 0 : i32
    return %c0_i32, %c0_i32_0 : i32, i32
  }
  func.func @transform_2(%arg0: i32) -> (i32, i32) {
    %c0_i32 = arith.constant 0 : i32
    %c0_i32_0 = arith.constant 0 : i32
    return %arg0, %c0_i32 : i32, i32
  }
}

</mosaic_0001>

<bundles_post_ra>
// kernel: tpu_custom_call.1
= control target key start
LH: loop header
LB: loop body
LE: loop exit
PB: predicated region body
PF: predicated region fallthrough
CT: control target
= control target key end

     0   :  { %s464_s9 = smov 0   ;;  %s609_s0 = inlined_call_operand.vmem [shape: s32[256,2], index: 0, kind: input, shape index: {}]   ;;  %s610_s1 = inlined_call_operand.vmem [shape: s32[3,60], index: 1, kind: input, shape index: {}]   ;;  %s611_s2 = inlined_call_operand.vmem [shape: s32[256,60], index: 2, kind: output, shape index: {}]  }
   0x1 LB: > { %s411_s10 = sadd.s32 4294967295, %s445_s9   ;;  %p415_p0 = scmp.ge.s32.totalorder %s445_s9, 1  ;;  %s445_s9 = sphi %s464_s9, %s12_s9  }
   0x2   : > { %p113_p1 = scmp.lt.s32.totalorder %s445_s9, 3 }
   0x4   : > { %p114_p2 = pnand %p415_p0, %p113_p1 }
   0x5   : > { %s416_s11 = sshll.u32 (!%p114_p2), %s411_s10, 4  ;;  %v447_v0 = vmov (!%p114_p2), 0   ;;  %v448_v17 = vmov (!%p114_p2), 1   ;;  %v499_v34 = vld [vmem:[%s610_s1] ss:$0 sm:$0xff] (!%p114_p2)  ;;  %vm338_vm0 = vcmask (!%p114_p2), 490496  }
   0x6   : > { %117 = sbr.rel (%p114_p2) target bundleno = 213 (0xd5), region = 28  ;;  %436 = vset.pattern.permute.xlu1 (!%p114_p2), %v447_v0  ;;  %435 = vset.pattern.permute.xlu0 (!%p114_p2), %v447_v0  ;;  %p136_p3 = scmp.lt.s32.totalorder (!%p114_p2), %s416_s11, 31  ;;  %v504_v35 = vld [vmem:[%s610_s1 + $0x1] ss:$0 sm:$0xff] (!%p114_p2)  ;;  %v513_v42 = vld [vmem:[%s610_s1 + $0x2] ss:$0 sm:$0xff] (!%p114_p2) }
   0xd   : > { %s613_s11 = smov (!%p136_p3, %s416_s11), 31 }
   0xe   : > { %s417_s12 = sshll.u32 %s613_s11, 3 }
   0xf   : > { %s139_s15 = scalar_lea.vmem %s609_s0, %s417_s12  ;;  %s520_s24 = scalar_lea.vmem %s611_s2, %s417_s12 }
  0x10   : > { %v149_v1 = vld [vmem:[%s139_s15 + $0x10] sm:$0xff]  ;;  %v147_v2 = vld [vmem:[%s139_s15] sm:$0xff]  ;;  %v150_v3 = vld [vmem:[%s139_s15 + $0x18] sm:$0xff] }
  0x11   : > { %173 = vperm.xlu1 %436, %v149_v1   ;;  %167 = vperm.xlu0 %435, %v147_v2   ;;  %v148_v4 = vld [vmem:[%s139_s15 + $0x8] sm:$0xff]  ;;  %v151_v6 = vld [vmem:[%s139_s15 + $0x20] sm:$0xff]  ;;  %v154_v7 = vld [vmem:[%s139_s15 + $0x38] sm:$0xff] }
  0x12   : > { %v152_v5 = vld [vmem:[%s139_s15 + $0x28] sm:$0xff]  ;;  %v153_v8 = vld [vmem:[%s139_s15 + $0x30] sm:$0xff]  ;;  %v155_v10 = vld [vmem:[%s139_s15 + $0x40] sm:$0xff] }
  0x13   : > { %v156_v9 = vld [vmem:[%s139_s15 + $0x48] sm:$0xff]  ;;  %v158_v11 = vld [vmem:[%s139_s15 + $0x58] sm:$0xff]  ;;  %v157_v12 = vld [vmem:[%s139_s15 + $0x50] sm:$0xff] }
  0x14   : > { %v160_v13 = vld [vmem:[%s139_s15 + $0x68] sm:$0xff]  ;;  %v159_v14 = vld [vmem:[%s139_s15 + $0x60] sm:$0xff]  ;;  %v162_v15 = vld [vmem:[%s139_s15 + $0x78] sm:$0xff] }
  0x15   : > { %176 = vperm.xlu1 %436, %v150_v3   ;;  %170 = vperm.xlu0 %435, %v148_v4   ;;  %v161_v16 = vld [vmem:[%s139_s15 + $0x70] sm:$0xff] }
  0x19   : > { %182 = vperm.xlu1 %436, %v152_v5   ;;  %179 = vperm.xlu0 %435, %v151_v6  }
  0x1d   : > { %188 = vperm.xlu1 %436, %v154_v7   ;;  %185 = vperm.xlu0 %435, %v153_v8  }
  0x21   : > { %194 = vperm.xlu1 %436, %v156_v9   ;;  %191 = vperm.xlu0 %435, %v155_v10  }
  0x25   : > { %200 = vperm.xlu1 %436, %v158_v11   ;;  %197 = vperm.xlu0 %435, %v157_v12  }
  0x29   : > { %206 = vperm.xlu1 %436, %v160_v13   ;;  %203 = vperm.xlu0 %435, %v159_v14  }
  0x2d   : > { %212 = vperm.xlu1 %436, %v162_v15   ;;  %209 = vperm.xlu0 %435, %v161_v16  }
  0x31   : > { %438 = vset.pattern.permute.xlu1 %v448_v17  ;;  %437 = vset.pattern.permute.xlu0 %v448_v17 }
  0x32   : > { %238 = vperm.xlu1 %438, %v148_v4   ;;  %235 = vperm.xlu0 %437, %v147_v2  }
  0x36   : > { %241 = vperm.xlu1 %438, %v149_v1   ;;  %244 = vperm.xlu0 %437, %v150_v3  }
  0x3a   : > { %247 = vperm.xlu1 %438, %v151_v6   ;;  %250 = vperm.xlu0 %437, %v152_v5  }
  0x3e   : > { %253 = vperm.xlu1 %438, %v153_v8   ;;  %256 = vperm.xlu0 %437, %v154_v7  }
  0x42   : > { %259 = vperm.xlu1 %438, %v155_v10   ;;  %262 = vperm.xlu0 %437, %v156_v9  }
  0x46   : > { %265 = vperm.xlu1 %438, %v157_v12   ;;  %268 = vperm.xlu0 %437, %v158_v11  }
  0x4a   : > { %271 = vperm.xlu1 %438, %v159_v14   ;;  %274 = vperm.xlu0 %437, %v160_v13  }
  0x4e   : > { %277 = vperm.xlu1 %438, %v161_v16   ;;  %280 = vperm.xlu0 %437, %v162_v15  }
  0x90   : > { %v174_v18 = vpop.permute.xlu1 %173  ;;  %v168_v19 = vpop.permute.xlu0 %167 }
  0x91   : > { %v218_v36 = vmul.u32 %v499_v34, %v168_v19  ;;  %v220_v45 = vmul.u32 %v499_v34, %v174_v18 }
  0x94   : > { %v177_v20 = vpop.permute.xlu1 %176  ;;  %v171_v21 = vpop.permute.xlu0 %170 }
  0x95   : > { %v219_v37 = vmul.u32 %v499_v34, %v171_v21  ;;  %v221_v46 = vmul.u32 %v499_v34, %v177_v20 }
  0x98   : > { %v183_v22 = vpop.permute.xlu1 %182  ;;  %v180_v23 = vpop.permute.xlu0 %179 }
  0x99   : > { %v223_v55 = vmul.u32 %v499_v34, %v183_v22  ;;  %v222_v56 = vmul.u32 %v499_v34, %v180_v23 }
  0x9c   : > { %v189_v24 = vpop.permute.xlu1 %188  ;;  %v186_v25 = vpop.permute.xlu0 %185 }
  0x9d   : > { %v225_v1 = vmul.u32 %v499_v34, %v189_v24  ;;  %v224_v2 = vmul.u32 %v499_v34, %v186_v25 }
  0xa0   : > { %v480_v26 = vpop.permute.xlu1 %194  ;;  %v482_v27 = vpop.permute.xlu0 %191 }
  0xa1   : > { %v227_v11 = vmul.u32 %v499_v34, %v480_v26  ;;  %v226_v12 = vmul.u32 %v499_v34, %v482_v27 }
  0xa4   : > { %v484_v28 = vpop.permute.xlu1 %200  ;;  %v486_v29 = vpop.permute.xlu0 %197 }
  0xa5   : > { %v229_v21 = vmul.u32 %v499_v34, %v484_v28  ;;  %v228_v22 = vmul.u32 %v499_v34, %v486_v29 }
  0xa8   : > { %v488_v30 = vpop.permute.xlu1 %206  ;;  %v490_v31 = vpop.permute.xlu0 %203 }
  0xa9   : > { %v231_v29 = vmul.u32 %v499_v34, %v488_v30 }
  0xac   : > { %v492_v32 = vpop.permute.xlu1 %212  ;;  %v494_v33 = vpop.permute.xlu0 %209 }
  0xb1   : > { %v239_v38 = vpop.permute.xlu1 %238  ;;  %v236_v39 = vpop.permute.xlu0 %235 }
  0xb2   : > { %v287_v40 = vmul.u32 %v504_v35, %v239_v38  ;;  %v286_v41 = vmul.u32 %v504_v35, %v236_v39 }
  0xb3   : > { %v230_v38 = vmul.u32 %v499_v34, %v490_v31  ;;  %v233_v31 = vmul.u32 %v499_v34, %v492_v32 }
  0xb4   : > { %v303_v43 = vadd.s32 %v287_v40, %v219_v37  ;;  %v302_v44 = vadd.s32 %v286_v41, %v218_v36 }
  0xb5   : > { %v242_v47 = vpop.permute.xlu1 %241  ;;  %v245_v48 = vpop.permute.xlu0 %244 }
  0xb6   : > { %v323_v49 = vadd.s32 %v513_v42, %v303_v43  ;;  %v322_v50 = vadd.s32 %v513_v42, %v302_v44  ;;  %v288_v51 = vmul.u32 %v504_v35, %v242_v47  ;;  %v289_v52 = vmul.u32 %v504_v35, %v245_v48 }
  0xb7   : > { %v232_v47 = vmul.u32 %v499_v34, %v494_v33 }
  0xb8   : > { %340 = vst.msk [vmem:[%s520_s24 + $0x8] sm:$0xff] %vm338_vm0, %v323_v49  ;;  %339 = vst.msk [vmem:[%s520_s24] sm:$0xff] %vm338_vm0, %v322_v50  ;;  %v304_v53 = vadd.s32 %v288_v51, %v220_v45  ;;  %v305_v54 = vadd.s32 %v289_v52, %v221_v46 }
  0xb9   : > { %v248_v57 = vpop.permute.xlu1 %247  ;;  %v251_v58 = vpop.permute.xlu0 %250 }
  0xba   : > { %v324_v59 = vadd.s32 %v513_v42, %v304_v53  ;;  %v325_v60 = vadd.s32 %v513_v42, %v305_v54  ;;  %v290_v61 = vmul.u32 %v504_v35, %v248_v57  ;;  %v291_v62 = vmul.u32 %v504_v35, %v251_v58 }
  0xbc   : > { %341 = vst.msk [vmem:[%s520_s24 + $0x10] sm:$0xff] %vm338_vm0, %v324_v59  ;;  %342 = vst.msk [vmem:[%s520_s24 + $0x18] sm:$0xff] %vm338_vm0, %v325_v60  ;;  %v306_v63 = vadd.s32 %v290_v61, %v222_v56  ;;  %v307_v0 = vadd.s32 %v291_v62, %v223_v55 }
  0xbd   : > { %v254_v3 = vpop.permute.xlu1 %253  ;;  %v257_v4 = vpop.permute.xlu0 %256 }
  0xbe   : > { %v326_v5 = vadd.s32 %v513_v42, %v306_v63  ;;  %v327_v6 = vadd.s32 %v513_v42, %v307_v0  ;;  %v292_v7 = vmul.u32 %v504_v35, %v254_v3  ;;  %v293_v8 = vmul.u32 %v504_v35, %v257_v4 }
  0xc0   : > { %343 = vst.msk [vmem:[%s520_s24 + $0x20] sm:$0xff] %vm338_vm0, %v326_v5  ;;  %344 = vst.msk [vmem:[%s520_s24 + $0x28] sm:$0xff] %vm338_vm0, %v327_v6  ;;  %v308_v9 = vadd.s32 %v292_v7, %v224_v2  ;;  %v309_v10 = vadd.s32 %v293_v8, %v225_v1 }
  0xc1   : > { %v260_v13 = vpop.permute.xlu1 %259  ;;  %v263_v14 = vpop.permute.xlu0 %262 }
  0xc2   : > { %v328_v15 = vadd.s32 %v513_v42, %v308_v9  ;;  %v329_v16 = vadd.s32 %v513_v42, %v309_v10  ;;  %v294_v17 = vmul.u32 %v504_v35, %v260_v13  ;;  %v295_v18 = vmul.u32 %v504_v35, %v263_v14 }
  0xc4   : > { %345 = vst.msk [vmem:[%s520_s24 + $0x30] sm:$0xff] %vm338_vm0, %v328_v15  ;;  %346 = vst.msk [vmem:[%s520_s24 + $0x38] sm:$0xff] %vm338_vm0, %v329_v16  ;;  %v310_v19 = vadd.s32 %v294_v17, %v226_v12  ;;  %v311_v20 = vadd.s32 %v295_v18, %v227_v11 }
  0xc5   : > { %v266_v23 = vpop.permute.xlu1 %265  ;;  %v269_v24 = vpop.permute.xlu0 %268 }
  0xc6   : > { %v330_v25 = vadd.s32 %v513_v42, %v310_v19  ;;  %v331_v26 = vadd.s32 %v513_v42, %v311_v20  ;;  %v296_v27 = vmul.u32 %v504_v35, %v266_v23  ;;  %v297_v36 = vmul.u32 %v504_v35, %v269_v24 }
  0xc8   : > { %347 = vst.msk [vmem:[%s520_s24 + $0x40] sm:$0xff] %vm338_vm0, %v330_v25  ;;  %348 = vst.msk [vmem:[%s520_s24 + $0x48] sm:$0xff] %vm338_vm0, %v331_v26  ;;  %v312_v28 = vadd.s32 %v296_v27, %v228_v22  ;;  %v313_v37 = vadd.s32 %v297_v36, %v229_v21 }
  0xc9   : > { %v272_v39 = vpop.permute.xlu1 %271  ;;  %v275_v40 = vpop.permute.xlu0 %274 }
  0xca   : > { %v332_v41 = vadd.s32 %v513_v42, %v312_v28  ;;  %v333_v43 = vadd.s32 %v513_v42, %v313_v37  ;;  %v298_v44 = vmul.u32 %v504_v35, %v272_v39  ;;  %v299_v45 = vmul.u32 %v504_v35, %v275_v40 }
  0xcc   : > { %349 = vst.msk [vmem:[%s520_s24 + $0x50] sm:$0xff] %vm338_vm0, %v332_v41  ;;  %350 = vst.msk [vmem:[%s520_s24 + $0x58] sm:$0xff] %vm338_vm0, %v333_v43  ;;  %v314_v30 = vadd.s32 %v298_v44, %v230_v38  ;;  %v315_v46 = vadd.s32 %v299_v45, %v231_v29 }
  0xcd   : > { %v278_v48 = vpop.permute.xlu1 %277  ;;  %v281_v49 = vpop.permute.xlu0 %280 }
  0xce   : > { %v334_v50 = vadd.s32 %v513_v42, %v314_v30  ;;  %v335_v51 = vadd.s32 %v513_v42, %v315_v46  ;;  %v300_v52 = vmul.u32 %v504_v35, %v278_v48  ;;  %v301_v53 = vmul.u32 %v504_v35, %v281_v49 }
  0xd0   : > { %351 = vst.msk [vmem:[%s520_s24 + $0x60] sm:$0xff] %vm338_vm0, %v334_v50  ;;  %352 = vst.msk [vmem:[%s520_s24 + $0x68] sm:$0xff] %vm338_vm0, %v335_v51  ;;  %v316_v54 = vadd.s32 %v300_v52, %v232_v47  ;;  %v317_v55 = vadd.s32 %v301_v53, %v233_v31 }
  0xd2   : > { %v336_v32 = vadd.s32 %v513_v42, %v316_v54  ;;  %v337_v33 = vadd.s32 %v513_v42, %v317_v55 }
  0xd4   : > { %353 = vst.msk [vmem:[%s520_s24 + $0x70] sm:$0xff] %vm338_vm0, %v336_v32  ;;  %354 = vst.msk [vmem:[%s520_s24 + $0x78] sm:$0xff] %vm338_vm0, %v337_v33 }
  0xd5 PF: > { %s12_s9 = sadd.s32 1, %s445_s9  }
  0xd6   : > { %p9_p4 = scmp.ge.s32.totalorder %s12_s9, 4  }
  0xd8   :  { %11 = sbr.rel (!%p9_p4) target bundleno = 1 (0x1), region = 58 }

</bundles_post_ra>
